<compile_context>
chip_gen: v7x
topology: tpu7x:2x2x1
jax: 0.10.0
libtpu: 0.0.40
codegen_flags: <defaults>
</compile_context>

<pallas_src>
import math
from functools import partial

import jax
import jax.numpy as jnp
from jax.experimental import pallas as pl
from jax.experimental.pallas import tpu as pltpu


def _mha_kernel(q_ref, k_ref, v_ref,
                wq_ref, bq_ref, wk_ref, bk_ref, wv_ref, bv_ref,
                wo_ref, bo_ref,
                out_ref,
                k_scr, v_scr,
                *, n_heads, head_dim, scale):
    H, Dh = n_heads, head_dim
    qi = pl.program_id(1)

    # ---- K / V projections: once per batch element, cached across q tiles ---
    @pl.when(qi == 0)
    def _():
        k_in = k_ref[0].astype(jnp.bfloat16)                        # (S, E)
        v_in = v_ref[0].astype(jnp.bfloat16)                        # (S, E)
        K = jnp.dot(k_in, wk_ref[...],
                    preferred_element_type=jnp.float32) + bk_ref[...]
        V = jnp.dot(v_in, wv_ref[...],
                    preferred_element_type=jnp.float32) + bv_ref[...]
        S = K.shape[0]
        # Cache per-head (H, S, Dh) bf16 so the relayout happens once / batch.
        k_scr[...] = jnp.transpose(K.reshape(S, H, Dh), (1, 0, 2)).astype(jnp.bfloat16)
        v_scr[...] = jnp.transpose(V.reshape(S, H, Dh), (1, 0, 2)).astype(jnp.bfloat16)

    # ---- Q projection for this query tile (scale folded in once) -----------
    q_in = q_ref[0].astype(jnp.bfloat16)                            # (tq, E)
    Q = jnp.dot(q_in, wq_ref[...],
                preferred_element_type=jnp.float32) + bq_ref[...]
    Q = Q * scale                                                   # 1/sqrt(Dh)
    tq = Q.shape[0]
    Qh = jnp.transpose(Q.reshape(tq, H, Dh), (1, 0, 2)).astype(jnp.bfloat16)  # (H,tq,Dh)

    Kh = k_scr[...]                                                 # (H, S, Dh) bf16
    Vh = v_scr[...]                                                 # (H, S, Dh) bf16

    # ---- Attention: batched over heads, softmax in f32 ---------------------
    s = jnp.einsum("hqd,hkd->hqk", Qh, Kh,
                   preferred_element_type=jnp.float32)              # (H, tq, S)
    m = jnp.max(s, axis=-1, keepdims=True)
    e = jnp.exp(s - m)
    p = e * pl.reciprocal(jnp.sum(e, axis=-1, keepdims=True), approx=True)
    # TODO(synk): attention-prob dropout skipped (eval-mode identity); mask=None only.

    ctx = jnp.einsum("hqk,hkd->hqd", p.astype(jnp.bfloat16), Vh,
                     preferred_element_type=jnp.float32)            # (H, tq, Dh)
    concat = jnp.transpose(ctx, (1, 0, 2)).reshape(tq, H * Dh).astype(jnp.bfloat16)

    # ---- Output projection --------------------------------------------------
    out = jnp.dot(concat, wo_ref[...],
                  preferred_element_type=jnp.float32) + bo_ref[...]
    out_ref[0] = out.astype(out_ref.dtype)


def _pick_q_tile(seq_len):
    """Largest query tile that satisfies the (8,128) block constraint."""
    if seq_len <= 512:
        return seq_len                      # full extent is always legal
    for t in (512, 256, 128, 64, 32, 16, 8):
        if seq_len % t == 0:
            return t
    return seq_len


def multi_head_attention(query, key, value, params, *, n_heads):
    """query/key/value: (B, S, E) float32.  params: PyTorch-convention dict."""
    B, S, E = query.shape
    head_dim = E // n_heads
    assert head_dim * n_heads == E

    # Pre-transpose (out,in) -> (in,out) once, cast weights to bf16 for the MXU.
    wq = params["wq"].T.astype(jnp.bfloat16)
    wk = params["wk"].T.astype(jnp.bfloat16)
    wv = params["wv"].T.astype(jnp.bfloat16)
    wo = params["wo"].T.astype(jnp.bfloat16)
    bq = params["bq"].reshape(1, E).astype(jnp.float32)
    bk = params["bk"].reshape(1, E).astype(jnp.float32)
    bv = params["bv"].reshape(1, E).astype(jnp.float32)
    bo = params["bo"].reshape(1, E).astype(jnp.float32)

    tq = _pick_q_tile(S)
    n_q = S // tq

    q_spec = pl.BlockSpec((1, tq, E), lambda b, qi: (b, qi, 0))
    kv_spec = pl.BlockSpec((1, S, E), lambda b, qi: (b, 0, 0))   # constant over qi
    w_spec = pl.BlockSpec((E, E), lambda b, qi: (0, 0))
    b_spec = pl.BlockSpec((1, E), lambda b, qi: (0, 0))
    out_spec = pl.BlockSpec((1, tq, E), lambda b, qi: (b, qi, 0))

    kernel = partial(_mha_kernel, n_heads=n_heads, head_dim=head_dim,
                     scale=1.0 / math.sqrt(float(head_dim)))

    flops = int(B * (8 * S * E * E + 4 * S * S * E))
    transcendentals = int(B * n_heads * S * S)
    bytes_accessed = int(4 * B * S * E * 4 + 4 * E * E * 2 + 4 * E * 4)

    return pl.pallas_call(
        kernel,
        out_shape=jax.ShapeDtypeStruct((B, S, E), query.dtype),
        grid_spec=pltpu.PrefetchScalarGridSpec(
            num_scalar_prefetch=0,
            grid=(B, n_q),
            in_specs=[q_spec, kv_spec, kv_spec,
                      w_spec, b_spec, w_spec, b_spec, w_spec, b_spec,
                      w_spec, b_spec],
            out_specs=out_spec,
            scratch_shapes=[
                pltpu.VMEM((n_heads, S, head_dim), jnp.bfloat16),   # K cache
                pltpu.VMEM((n_heads, S, head_dim), jnp.bfloat16),   # V cache
            ],
        ),
        compiler_params=pltpu.CompilerParams(
            dimension_semantics=("parallel", "arbitrary")),
        cost_estimate=pl.CostEstimate(flops=flops,
                                      transcendentals=transcendentals,
                                      bytes_accessed=bytes_accessed),
    )(query, key, value, wq, bq, wk, bk, wv, bv, wo, bo)


def _reference(query, key, value, params, *, n_heads):
    """Pure-JAX f32 reference mirroring the PyTorch forward (eval mode)."""
    B, S, E = query.shape
    Dh = E // n_heads

    def lin(x, w, b):
        return x @ w.T + b

    Q = lin(query, params["wq"], params["bq"]).reshape(B, S, n_heads, Dh).transpose(0, 2, 1, 3)
    K = lin(key, params["wk"], params["bk"]).reshape(B, S, n_heads, Dh).transpose(0, 2, 1, 3)
    V = lin(value, params["wv"], params["bv"]).reshape(B, S, n_heads, Dh).transpose(0, 2, 1, 3)

    scores = jnp.einsum("bhqd,bhkd->bhqk", Q, K) / jnp.sqrt(jnp.float32(Dh))
    scores = jax.nn.softmax(scores, axis=-1)
    ctx = jnp.einsum("bhqk,bhkd->bhqd", scores, V)
    concat = ctx.transpose(0, 2, 1, 3).reshape(B, S, E)
    return lin(concat, params["wo"], params["bo"])


def init_params(key, embed_dim):
    ks = jax.random.split(key, 8)
    bound = 1.0 / math.sqrt(embed_dim)

    def u(k, shape):
        return jax.random.uniform(k, shape, jnp.float32, -bound, bound)

    return {
        "wq": u(ks[0], (embed_dim, embed_dim)), "bq": u(ks[1], (embed_dim,)),
        "wk": u(ks[2], (embed_dim, embed_dim)), "bk": u(ks[3], (embed_dim,)),
        "wv": u(ks[4], (embed_dim, embed_dim)), "bv": u(ks[5], (embed_dim,)),
        "wo": u(ks[6], (embed_dim, embed_dim)), "bo": u(ks[7], (embed_dim,)),
    }


if __name__ == "__main__":
    B, S, E, H = 2, 8, 32, 4

    root = jax.random.PRNGKey(0)
    kp, kq, kk, kv = jax.random.split(root, 4)

    params = init_params(kp, E)
    query = jax.random.normal(kq, (B, S, E), jnp.float32)
    key_t = jax.random.normal(kk, (B, S, E), jnp.float32)
    value = jax.random.normal(kv, (B, S, E), jnp.float32)

    out = multi_head_attention(query, key_t, value, params, n_heads=H)
    out = jax.block_until_ready(out)

    ref = _reference(query, key_t, value, params, n_heads=H)
    assert out.shape == (B, S, E)
    # bf16 MXU operands + approx reciprocal -> relaxed tolerance vs f32 reference.
    assert jnp.allclose(out, ref, atol=5e-2, rtol=5e-2), (
        float(jnp.max(jnp.abs(out - ref))))

    print("KERNEL_OK")
</pallas_src>

<mosaic_0001>
module attributes {stable_mosaic.version = 11 : i64} {
  func.func @_mha_kernel(%arg0: i32, %arg1: i32, %arg2: memref<1x8x32xf32, #tpu.memory_space<vmem>>, %arg3: memref<1x8x32xf32, #tpu.memory_space<vmem>>, %arg4: memref<1x8x32xf32, #tpu.memory_space<vmem>>, %arg5: memref<32x32xbf16, #tpu.memory_space<vmem>>, %arg6: memref<1x32xf32, #tpu.memory_space<vmem>>, %arg7: memref<32x32xbf16, #tpu.memory_space<vmem>>, %arg8: memref<1x32xf32, #tpu.memory_space<vmem>>, %arg9: memref<32x32xbf16, #tpu.memory_space<vmem>>, %arg10: memref<1x32xf32, #tpu.memory_space<vmem>>, %arg11: memref<32x32xbf16, #tpu.memory_space<vmem>>, %arg12: memref<1x32xf32, #tpu.memory_space<vmem>>, %arg13: memref<1x8x32xf32, #tpu.memory_space<vmem>>, %arg14: memref<4x8x8xbf16, #tpu.memory_space<vmem>>, %arg15: memref<4x8x8xbf16, #tpu.memory_space<vmem>>) attributes {dimension_semantics = [#tpu.dimension_semantics<parallel>, #tpu.dimension_semantics<arbitrary>], iteration_bounds = array<i64: 2, 1>, scalar_prefetch = 0 : i64, scratch_operands = 2 : i64, tpu.core_type = #tpu.core_type<tc>, window_params = [{transform_indices = @transform_0, window_bounds = array<i64: 1, 8, 32>}, {transform_indices = @transform_1, window_bounds = array<i64: 1, 8, 32>}, {transform_indices = @transform_2, window_bounds = array<i64: 1, 8, 32>}, {pipeline_mode = #tpu.pipeline_mode<synchronous>, transform_indices = @transform_3, window_bounds = array<i64: 32, 32>}, {pipeline_mode = #tpu.pipeline_mode<synchronous>, transform_indices = @transform_4, window_bounds = array<i64: 1, 32>}, {pipeline_mode = #tpu.pipeline_mode<synchronous>, transform_indices = @transform_5, window_bounds = array<i64: 32, 32>}, {pipeline_mode = #tpu.pipeline_mode<synchronous>, transform_indices = @transform_6, window_bounds = array<i64: 1, 32>}, {pipeline_mode = #tpu.pipeline_mode<synchronous>, transform_indices = @transform_7, window_bounds = array<i64: 32, 32>}, {pipeline_mode = #tpu.pipeline_mode<synchronous>, transform_indices = @transform_8, window_bounds = array<i64: 1, 32>}, {pipeline_mode = #tpu.pipeline_mode<synchronous>, transform_indices = @transform_9, window_bounds = array<i64: 32, 32>}, {pipeline_mode = #tpu.pipeline_mode<synchronous>, transform_indices = @transform_10, window_bounds = array<i64: 1, 32>}, {transform_indices = @transform_11, window_bounds = array<i64: 1, 8, 32>}]} {
    %c0_i32 = arith.constant 0 : i32
    %0 = arith.cmpi eq, %arg1, %c0_i32 : i32
    %1 = arith.extui %0 : i1 to i32
    %c0_i32_0 = arith.constant 0 : i32
    %2 = arith.cmpi ne, %1, %c0_i32_0 : i32
    scf.if %2 {
      %c0_26 = arith.constant 0 : index
      %c0_27 = arith.constant 0 : index
      %c0_28 = arith.constant 0 : index
      %42 = vector.load %arg3[%c0_26, %c0_27, %c0_28] : memref<1x8x32xf32, #tpu.memory_space<vmem>>, vector<1x8x32xf32>
      %43 = vector.shape_cast %42 : vector<1x8x32xf32> to vector<8x32xf32>
      %44 = arith.truncf %43 : vector<8x32xf32> to vector<8x32xbf16>
      %c0_29 = arith.constant 0 : index
      %c0_30 = arith.constant 0 : index
      %c0_31 = arith.constant 0 : index
      %45 = vector.load %arg4[%c0_29, %c0_30, %c0_31] : memref<1x8x32xf32, #tpu.memory_space<vmem>>, vector<1x8x32xf32>
      %46 = vector.shape_cast %45 : vector<1x8x32xf32> to vector<8x32xf32>
      %47 = arith.truncf %46 : vector<8x32xf32> to vector<8x32xbf16>
      %c0_32 = arith.constant 0 : index
      %c0_33 = arith.constant 0 : index
      %48 = vector.load %arg7[%c0_32, %c0_33] : memref<32x32xbf16, #tpu.memory_space<vmem>>, vector<32x32xbf16>
      %cst_34 = arith.constant dense<0.000000e+00> : vector<8x32xf32>
      %49 = tpu.matmul %44, %48, %cst_34 {dimension_numbers = #tpu.dot_dimension_numbers<[1], [0], [0], [1], [0, 0, 1, 1], [], []>} : vector<8x32xbf16>, vector<32x32xbf16>, vector<8x32xf32> -> vector<8x32xf32>
      %c0_35 = arith.constant 0 : index
      %c0_36 = arith.constant 0 : index
      %50 = vector.load %arg8[%c0_35, %c0_36] : memref<1x32xf32, #tpu.memory_space<vmem>>, vector<1x32xf32>
      %51 = vector.broadcast %50 : vector<1x32xf32> to vector<8x32xf32>
      %52 = arith.addf %49, %51 : vector<8x32xf32>
      %c0_37 = arith.constant 0 : index
      %c0_38 = arith.constant 0 : index
      %53 = vector.load %arg9[%c0_37, %c0_38] : memref<32x32xbf16, #tpu.memory_space<vmem>>, vector<32x32xbf16>
      %cst_39 = arith.constant dense<0.000000e+00> : vector<8x32xf32>
      %54 = tpu.matmul %47, %53, %cst_39 {dimension_numbers = #tpu.dot_dimension_numbers<[1], [0], [0], [1], [0, 0, 1, 1], [], []>} : vector<8x32xbf16>, vector<32x32xbf16>, vector<8x32xf32> -> vector<8x32xf32>
      %c0_40 = arith.constant 0 : index
      %c0_41 = arith.constant 0 : index
      %55 = vector.load %arg10[%c0_40, %c0_41] : memref<1x32xf32, #tpu.memory_space<vmem>>, vector<1x32xf32>
      %56 = vector.broadcast %55 : vector<1x32xf32> to vector<8x32xf32>
      %57 = arith.addf %54, %56 : vector<8x32xf32>
      %58 = vector.shape_cast %52 : vector<8x32xf32> to vector<8x4x8xf32>
      %59 = tpu.transpose %58, [1, 0, 2] : vector<8x4x8xf32> -> vector<4x8x8xf32>
      %60 = arith.truncf %59 : vector<4x8x8xf32> to vector<4x8x8xbf16>
      %c0_42 = arith.constant 0 : index
      %c0_43 = arith.constant 0 : index
      %c0_44 = arith.constant 0 : index
      %61 = vector.load %arg14[%c0_42, %c0_43, %c0_44] : memref<4x8x8xbf16, #tpu.memory_space<vmem>>, vector<4x8x8xbf16>
      tpu.vector_store %arg14[%c0_42, %c0_43, %c0_44], %60 {strides = array<i32>} : memref<4x8x8xbf16, #tpu.memory_space<vmem>>, vector<4x8x8xbf16>,
      %62 = vector.shape_cast %57 : vector<8x32xf32> to vector<8x4x8xf32>
      %63 = tpu.transpose %62, [1, 0, 2] : vector<8x4x8xf32> -> vector<4x8x8xf32>
      %64 = arith.truncf %63 : vector<4x8x8xf32> to vector<4x8x8xbf16>
      %c0_45 = arith.constant 0 : index
      %c0_46 = arith.constant 0 : index
      %c0_47 = arith.constant 0 : index
      %65 = vector.load %arg15[%c0_45, %c0_46, %c0_47] : memref<4x8x8xbf16, #tpu.memory_space<vmem>>, vector<4x8x8xbf16>
      tpu.vector_store %arg15[%c0_45, %c0_46, %c0_47], %64 {strides = array<i32>} : memref<4x8x8xbf16, #tpu.memory_space<vmem>>, vector<4x8x8xbf16>,
    } else {
    }
    %c0 = arith.constant 0 : index
    %c0_1 = arith.constant 0 : index
    %c0_2 = arith.constant 0 : index
    %3 = vector.load %arg2[%c0, %c0_1, %c0_2] : memref<1x8x32xf32, #tpu.memory_space<vmem>>, vector<1x8x32xf32>
    %4 = vector.shape_cast %3 : vector<1x8x32xf32> to vector<8x32xf32>
    %5 = arith.truncf %4 : vector<8x32xf32> to vector<8x32xbf16>
    %c0_3 = arith.constant 0 : index
    %c0_4 = arith.constant 0 : index
    %6 = vector.load %arg5[%c0_3, %c0_4] : memref<32x32xbf16, #tpu.memory_space<vmem>>, vector<32x32xbf16>
    %cst = arith.constant dense<0.000000e+00> : vector<8x32xf32>
    %7 = tpu.matmul %5, %6, %cst {dimension_numbers = #tpu.dot_dimension_numbers<[1], [0], [0], [1], [0, 0, 1, 1], [], []>} : vector<8x32xbf16>, vector<32x32xbf16>, vector<8x32xf32> -> vector<8x32xf32>
    %c0_5 = arith.constant 0 : index
    %c0_6 = arith.constant 0 : index
    %8 = vector.load %arg6[%c0_5, %c0_6] : memref<1x32xf32, #tpu.memory_space<vmem>>, vector<1x32xf32>
    %9 = vector.broadcast %8 : vector<1x32xf32> to vector<8x32xf32>
    %10 = arith.addf %7, %9 : vector<8x32xf32>
    %cst_7 = arith.constant 0.353553385 : f32
    %11 = vector.broadcast %cst_7 : f32 to vector<8x32xf32>
    %12 = arith.mulf %10, %11 : vector<8x32xf32>
    %13 = vector.shape_cast %12 : vector<8x32xf32> to vector<8x4x8xf32>
    %14 = tpu.transpose %13, [1, 0, 2] : vector<8x4x8xf32> -> vector<4x8x8xf32>
    %15 = arith.truncf %14 : vector<4x8x8xf32> to vector<4x8x8xbf16>
    %c0_8 = arith.constant 0 : index
    %c0_9 = arith.constant 0 : index
    %c0_10 = arith.constant 0 : index
    %16 = vector.load %arg14[%c0_8, %c0_9, %c0_10] : memref<4x8x8xbf16, #tpu.memory_space<vmem>>, vector<4x8x8xbf16>
    %c0_11 = arith.constant 0 : index
    %c0_12 = arith.constant 0 : index
    %c0_13 = arith.constant 0 : index
    %17 = vector.load %arg15[%c0_11, %c0_12, %c0_13] : memref<4x8x8xbf16, #tpu.memory_space<vmem>>, vector<4x8x8xbf16>
    "tpu.trace_start"() <{level = 10 : i32, message = "hqd,hkd->hqk"}> : () -> ()
    %cst_14 = arith.constant dense<0.000000e+00> : vector<4x8x8xf32>
    %18 = tpu.matmul %15, %16, %cst_14 {dimension_numbers = #tpu.dot_dimension_numbers<[2], [2], [1], [1], [0, 0, 0, 1, 1, 1], [0], [0]>} : vector<4x8x8xbf16>, vector<4x8x8xbf16>, vector<4x8x8xf32> -> vector<4x8x8xf32>
    "tpu.trace_stop"() : () -> ()
    %cst_15 = arith.constant dense<0xFF800000> : vector<4x8xf32>
    %19 = vector.multi_reduction <maximumf>, %18, %cst_15 [2] : vector<4x8x8xf32> to vector<4x8xf32>
    %20 = vector.shape_cast %19 : vector<4x8xf32> to vector<4x8x1xf32>
    %21 = vector.broadcast %20 : vector<4x8x1xf32> to vector<4x8x8xf32>
    %22 = arith.subf %18, %21 : vector<4x8x8xf32>
    %23 = math.exp %22 : vector<4x8x8xf32>
    %cst_16 = arith.constant dense<0.000000e+00> : vector<4x8xf32>
    %24 = vector.multi_reduction <add>, %23, %cst_16 [2] : vector<4x8x8xf32> to vector<4x8xf32>
    %25 = vector.shape_cast %24 : vector<4x8xf32> to vector<4x8x1xf32>
    %26 = tpu.reciprocal %25 {approx = true} : vector<4x8x1xf32> -> vector<4x8x1xf32>
    %27 = vector.broadcast %26 : vector<4x8x1xf32> to vector<4x8x8xf32>
    %28 = arith.mulf %23, %27 : vector<4x8x8xf32>
    %29 = arith.truncf %28 : vector<4x8x8xf32> to vector<4x8x8xbf16>
    "tpu.trace_start"() <{level = 10 : i32, message = "hqk,hkd->hqd"}> : () -> ()
    %cst_17 = arith.constant dense<0.000000e+00> : vector<4x8x8xf32>
    %30 = tpu.matmul %29, %17, %cst_17 {dimension_numbers = #tpu.dot_dimension_numbers<[2], [1], [1], [2], [0, 0, 0, 1, 1, 2], [0], [0]>} : vector<4x8x8xbf16>, vector<4x8x8xbf16>, vector<4x8x8xf32> -> vector<4x8x8xf32>
    "tpu.trace_stop"() : () -> ()
    %31 = tpu.transpose %30, [1, 0, 2] : vector<4x8x8xf32> -> vector<8x4x8xf32>
    %32 = vector.shape_cast %31 : vector<8x4x8xf32> to vector<8x32xf32>
    %33 = arith.truncf %32 : vector<8x32xf32> to vector<8x32xbf16>
    %c0_18 = arith.constant 0 : index
    %c0_19 = arith.constant 0 : index
    %34 = vector.load %arg11[%c0_18, %c0_19] : memref<32x32xbf16, #tpu.memory_space<vmem>>, vector<32x32xbf16>
    %cst_20 = arith.constant dense<0.000000e+00> : vector<8x32xf32>
    %35 = tpu.matmul %33, %34, %cst_20 {dimension_numbers = #tpu.dot_dimension_numbers<[1], [0], [0], [1], [0, 0, 1, 1], [], []>} : vector<8x32xbf16>, vector<32x32xbf16>, vector<8x32xf32> -> vector<8x32xf32>
    %c0_21 = arith.constant 0 : index
    %c0_22 = arith.constant 0 : index
    %36 = vector.load %arg12[%c0_21, %c0_22] : memref<1x32xf32, #tpu.memory_space<vmem>>, vector<1x32xf32>
    %37 = vector.broadcast %36 : vector<1x32xf32> to vector<8x32xf32>
    %38 = arith.addf %35, %37 : vector<8x32xf32>
    %c0_23 = arith.constant 0 : index
    %c0_24 = arith.constant 0 : index
    %c0_25 = arith.constant 0 : index
    %39 = vector.load %arg13[%c0_23, %c0_24, %c0_25] : memref<1x8x32xf32, #tpu.memory_space<vmem>>, vector<1x8x32xf32>
    %40 = vector.shape_cast %39 : vector<1x8x32xf32> to vector<8x32xf32>
    %41 = vector.shape_cast %38 : vector<8x32xf32> to vector<1x8x32xf32>
    tpu.vector_store %arg13[%c0_23, %c0_24, %c0_25], %41 {strides = array<i32>} : memref<1x8x32xf32, #tpu.memory_space<vmem>>, vector<1x8x32xf32>,
    return
  }
  func.func @transform_0(%arg0: i32, %arg1: i32) -> (i32, i32, i32) {
    %c0_i32 = arith.constant 0 : i32
    %c0_i32_0 = arith.constant 0 : i32
    return %arg0, %arg1, %c0_i32 : i32, i32, i32
  }
  func.func @transform_1(%arg0: i32, %arg1: i32) -> (i32, i32, i32) {
    %c0_i32 = arith.constant 0 : i32
    %c0_i32_0 = arith.constant 0 : i32
    %c0_i32_1 = arith.constant 0 : i32
    return %arg0, %c0_i32, %c0_i32_0 : i32, i32, i32
  }
  func.func @transform_2(%arg0: i32, %arg1: i32) -> (i32, i32, i32) {
    %c0_i32 = arith.constant 0 : i32
    %c0_i32_0 = arith.constant 0 : i32
    %c0_i32_1 = arith.constant 0 : i32
    return %arg0, %c0_i32, %c0_i32_0 : i32, i32, i32
  }
  func.func @transform_3(%arg0: i32, %arg1: i32) -> (i32, i32) {
    %c0_i32 = arith.constant 0 : i32
    %c0_i32_0 = arith.constant 0 : i32
    %c0_i32_1 = arith.constant 0 : i32
    return %c0_i32, %c0_i32_0 : i32, i32
  }
  func.func @transform_4(%arg0: i32, %arg1: i32) -> (i32, i32) {
    %c0_i32 = arith.constant 0 : i32
    %c0_i32_0 = arith.constant 0 : i32
    %c0_i32_1 = arith.constant 0 : i32
    return %c0_i32, %c0_i32_0 : i32, i32
  }
  func.func @transform_5(%arg0: i32, %arg1: i32) -> (i32, i32) {
    %c0_i32 = arith.constant 0 : i32
    %c0_i32_0 = arith.constant 0 : i32
    %c0_i32_1 = arith.constant 0 : i32
    return %c0_i32, %c0_i32_0 : i32, i32
  }
  func.func @transform_6(%arg0: i32, %arg1: i32) -> (i32, i32) {
    %c0_i32 = arith.constant 0 : i32
    %c0_i32_0 = arith.constant 0 : i32
    %c0_i32_1 = arith.constant 0 : i32
    return %c0_i32, %c0_i32_0 : i32, i32
  }
  func.func @transform_7(%arg0: i32, %arg1: i32) -> (i32, i32) {
    %c0_i32 = arith.constant 0 : i32
    %c0_i32_0 = arith.constant 0 : i32
    %c0_i32_1 = arith.constant 0 : i32
    return %c0_i32, %c0_i32_0 : i32, i32
  }
  func.func @transform_8(%arg0: i32, %arg1: i32) -> (i32, i32) {
    %c0_i32 = arith.constant 0 : i32
    %c0_i32_0 = arith.constant 0 : i32
    %c0_i32_1 = arith.constant 0 : i32
    return %c0_i32, %c0_i32_0 : i32, i32
  }
  func.func @transform_9(%arg0: i32, %arg1: i32) -> (i32, i32) {
    %c0_i32 = arith.constant 0 : i32
    %c0_i32_0 = arith.constant 0 : i32
    %c0_i32_1 = arith.constant 0 : i32
    return %c0_i32, %c0_i32_0 : i32, i32
  }
  func.func @transform_10(%arg0: i32, %arg1: i32) -> (i32, i32) {
    %c0_i32 = arith.constant 0 : i32
    %c0_i32_0 = arith.constant 0 : i32
    %c0_i32_1 = arith.constant 0 : i32
    return %c0_i32, %c0_i32_0 : i32, i32
  }
  func.func @transform_11(%arg0: i32, %arg1: i32) -> (i32, i32, i32) {
    %c0_i32 = arith.constant 0 : i32
    %c0_i32_0 = arith.constant 0 : i32
    return %arg0, %arg1, %c0_i32 : i32, i32, i32
  }
}

</mosaic_0001>

<bundles_post_ra>
// kernel: tpu_custom_call.1
= control target key start
LH: loop header
LB: loop body
LE: loop exit
PB: predicated region body
PF: predicated region fallthrough
CT: control target
= control target key end

     0   :  { %s3210_s0 = inlined_call_operand.hbm [shape: f32[2,8,32], index: 0, kind: input, shape index: {}]   ;;  %s3211_s1 = inlined_call_operand.hbm [shape: f32[2,8,32], index: 1, kind: input, shape index: {}]   ;;  %s3212_s2 = inlined_call_operand.hbm [shape: f32[2,8,32], index: 2, kind: input, shape index: {}]   ;;  %s3213_s3 = inlined_call_operand.hbm [shape: bf16[32,32], index: 3, kind: input, shape index: {}]   ;;  %s3214_s4 = inlined_call_operand.vmem [shape: f32[1,32], index: 4, kind: input, shape index: {}]   ;;  %s3215_s5 = inlined_call_operand.vmem [shape: bf16[32,32], index: 5, kind: input, shape index: {}]   ;;  %s3216_s6 = inlined_call_operand.vmem [shape: f32[1,32], index: 6, kind: input, shape index: {}]   ;;  %s3217_s7 = inlined_call_operand.hbm [shape: bf16[32,32], index: 7, kind: input, shape index: {}]   ;;  %s3218_s8 = inlined_call_operand.hbm [shape: f32[1,32], index: 8, kind: input, shape index: {}]   ;;  %s3219_s9 = inlined_call_operand.vmem [shape: bf16[32,32], index: 9, kind: input, shape index: {}]   ;;  %s3220_s10 = inlined_call_operand.vmem [shape: f32[1,32], index: 10, kind: input, shape index: {}]   ;;  %s3221_s11 = inlined_call_operand.hbm [shape: f32[2,8,32], index: 11, kind: output, shape index: {}]  }
   0x1   :  { %3247 = sst [smem:[#allocation29_spill]] %s3211_s1 }
   0x2   :  { %3248 = sst [smem:[#allocation30_spill]] %s3213_s3 }
   0x3   :  { %3249 = sst [smem:[#allocation31_spill]] %s3214_s4 }
   0x4   :  { %3250 = sst [smem:[#allocation32_spill]] %s3216_s6 }
   0x5   :  { %3251 = sst [smem:[#allocation33_spill]] %s3219_s9 }
   0x6   :  { %3252 = sst [smem:[#allocation34_spill]] %s3220_s10 }
   0x7   :  { %3253 = sst [smem:[#allocation35_spill]] %s3221_s11 }
   0x8   :  { %16 = vsyncpa [#allocation5], 0 }
   0x9   :  { %18 = vsyncpa [#allocation5 + $0x1], 0 }
   0xa   :  { %19 = vsyncpa [#allocation8], 0 }
   0xb   :  { %21 = vsyncpa [#allocation8 + $0x1], 0 }
   0xc   :  { %22 = vsyncpa [#allocation11], 0 }
   0xd   :  { %23 = vsyncpa [#allocation14], 0 }
   0xe   :  { %24 = vsyncpa [#allocation6], 0 }
   0xf   :  { %26 = vsyncpa [#allocation6 + $0x1], 0  ;;  %s2670_s17 = smov 0   ;;  %s2672_s18 = smov 0  }
  0x10   :  { %s2674_s19 = smov 0   ;;  %s2676_s20 = smov 0  }
  0x11   :  { %s2678_s21 = smov 0   ;;  %s2680_s22 = smov 0  }
  0x12 LB: > { %3254 = sst [smem:[#allocation21_spill]] %s2569_s17  ;;  %s2701_s23 = sadd.s32 4294967295, %s2589_s22   ;;  %s2589_s22 = sphi %s2680_s22, %s32_s22   ;;  %s2585_s21 = sphi %s2678_s21, %s3302_s21   ;;  %s2581_s20 = sphi %s2676_s20, %s3301_s20   ;;  %s2577_s19 = sphi %s2674_s19, %s3305_s19   ;;  %s2573_s18 = sphi %s2672_s18, %s3304_s18   ;;  %s2569_s17 = sphi %s2670_s17, %s3303_s17  }
  0x13   : > { %3255 = sst [smem:[#allocation22_spill]] %s2581_s20  ;;  %s2018_s24 = sadd.s32 4294967294, %s2589_s22  }
  0x14   : > { %3256 = sst [smem:[#allocation23_spill]] %s2585_s21  ;;  %p66_p0 = scmp.ne.s32.totalorder %s2573_s18, %s2569_s17 }
  0x15   : > { %3257 = sst [smem:[#allocation24_spill]] %s2589_s22  ;;  %p3224_p1 = scmp.eq.s32.totalorder %s2701_s23, 0 }
  0x16   : > { %p318_p3 = scmp.eq.s32.totalorder %s2018_s24, 1  ;;  %p2019_p5 = scmp.ge.s32.totalorder %s2589_s22, 1 }
  0x17   : > { %p2710_p4 = por %p3224_p1, %p66_p0  ;;  %p325_p7 = scmp.lt.s32.totalorder %s2589_s22, 3 }
  0x18   : > { %p2715_p6 = por %p318_p3, %p66_p0  ;;  %s2591_s28 = smov [#allocation10]  }
  0x19   : > { %s3258_s25 = scalar_select %p2710_p4, 1, 0 }
  0x1a   : > { %s3259_s26 = scalar_select %p2715_p6, 1, 0 }
  0x1b   : > { %p2720_p8 = pnand %p2019_p5, %p325_p7  ;;  %s337_s29 = sshll.u32 %s2591_s28, 4  ;;  %s338_s29 = int_to_ptr.vmem [resolvable:$true] %s337_s29 }
  0x1c   : > { %3260 = sst [smem:[#allocation25_spill]] %s3259_s26  ;;  %s44_s12 = sadd.s32 1, %s2585_s21 }
  0x1d   : > { %s3261_s27 = scalar_select %p2720_p8, 1, 0 }
  0x1e   : > { %p2202_p9 = pneg %p2720_p8  ;;  %s3263_s3 = sld [smem:[#allocation30_spill]] }
  0x20   : > { %p2729_p11 = pnand %p2202_p9, %p3224_p1 }
  0x22   : > { %s3262_s30 = scalar_select %p2729_p11, 1, 0 }
  0x23   : > { %p2742_p13 = pneg %p2729_p11 }
  0x24   : > { %s2321_s15 = scalar_lea.hbm %s3263_s3, 256 }
  0x25   : > { %p2322_p12 = scmp.ne.s32.totalorder %s3263_s3, %s2321_s15  ;;  %p2328_p5 = scmp.lt.u32.totalorder %s2321_s15, %s3263_s3 }
  0x26   : > { %s3264_s28 = scalar_select %p2742_p13, 1, 0 }
  0x27   : > { %p2324_p0 = pnand %p2742_p13, %p2322_p12 }
  0x29   : > { %p2325_p3 = pneg %p2324_p0 }
  0x2b   : > { %p2330_p7 = pnand %p2328_p5, %p2325_p3 }
  0x2d   : > { %2333 = shalt.err (!%p2330_p7)
}
  0x2e   : > { %s2334_s13 = scalar_lea.vmem %s338_s29, 256  ;;  %p2342_p2 = scmp.lt.s32.totalorder %s338_s29, %s338_s29 }
  0x2f   : > { %p2335_p9 = scmp.ne.s32.totalorder %s338_s29, %s2334_s13  ;;  %p2343_p6 = scmp.lt.s32.totalorder %s2334_s13, %s2334_s13 }
  0x31   : > { %p2337_p10 = pnand %p2335_p9, %p2742_p13  ;;  %p2344_p4 = por %p2343_p6, %p2342_p2 }
  0x33   : > { %p2338_p1 = pneg %p2337_p10 }
  0x35   : > { %p2345_p8 = pnand %p2344_p4, %p2338_p1 }
  0x37   : > { %2348 = shalt.err (!%p2345_p8)
}
  0x38   : > { %s3228_s14 = smov 64   ;;  %s3229_s17 = smov 4  }
  0x39   : > { %2205 = dma.hbm_to_vmem [thread:$0]  (!%p2729_p11), %s3263_s3, 256, %s338_s29, [#allocation11], %s3228_s14, %s3228_s14, %s3229_s17  }
  0x3a   : > { %p46_p1 = scmp.ge.s32.totalorder %s44_s12, 2  ;;  %s53_s16 = sadd.s32 1, %s2577_s19 }
  0x3b   : > { %p60_p2 = scmp.ne.s32.totalorder %s2577_s19, %s2573_s18  ;;  %p61_p4 = scmp.eq.s32.totalorder %s2589_s22, 0 }
  0x3c   : > { %s3307_s12 = smov (%p46_p1, %s44_s12), 0  ;;  %p3266_p8 = scmp.eq.s32.totalorder %s2701_s23, 1 }
  0x3d   : > { %3265 = sst [smem:[#allocation26_spill]] %s3307_s12  ;;  %p62_p6 = por %p61_p4, %p60_p2 }
  0x3e   : > { %p2769_p10 = por %p3266_p8, %p60_p2  ;;  %s48_s13 = ssub.s32 %s2585_s21, %s3307_s12 }
  0x3f   : > { %p2229_p12 = scmp.lt.s32.totalorder %s2589_s22, 2  ;;  %p51_p0 = scmp.eq.s32.totalorder %s48_s13, 0 }
  0x40   : > { %s3267_s24 = scalar_select %p2769_p10, 1, 0 }
  0x41   : > { %s3231_s11 = sand.u32 1, %s2577_s19   ;;  %s2782_s26 = sshll.u32 %s2585_s21, 7 }
  0x42   : > { %3268 = sst [smem:[#allocation27_spill]] %s3267_s24  ;;  %s2779_s29 = sshll.u32 %s3231_s11, 3 }
  0x43   : > { %s2785_s15 = scalar_select %p51_p0, %s2577_s19, %s53_s16  }
  0x44   : > { %p2787_p3 = pnand %p2229_p12, %p62_p6  ;;  %s409_s17 = sand.u32 1, %s2589_s22  }
  0x45   : > { %3269 = sst [smem:[#allocation28_spill]] %s2785_s15  ;;  %s3271_s1 = sld [smem:[#allocation29_spill]] }
  0x46   : > { %s3270_s14 = scalar_select %p2787_p3, 1, 0 }
  0x47   : > { %s413_s11 = scalar_lea.vmem [#allocation7], %s2779_s29  ;;  %s2594_s16 = smov [#allocation12]  }
  0x48   : > { %s420_s21 = sshll.u32 %s413_s11, 4  ;;  %s2801_s15 = sshll.u32 %s2594_s16, 4  ;;  %s2799_s21 = int_to_ptr.vmem [resolvable:$true] %s420_s21  ;;  %s360_s15 = int_to_ptr.vmem [resolvable:$true] %s2801_s15 }
  0x49   : > { %s2803_s24 = scalar_lea.sflag [#allocation8], %s409_s17  ;;  %p2809_p7 = pneg %p2787_p3 }
  0x4b   : > { %s2796_s13 = scalar_lea.hbm %s3271_s1, %s2782_s26  ;;  %s2354_s22 = scalar_lea.hbm %s3271_s1, 256 }
  0x4c   : > { %s2349_s10 = scalar_lea.hbm %s2796_s13, 128  ;;  %p2355_p2 = scmp.lt.u32.totalorder %s2796_s13, %s3271_s1 }
  0x4d   : > { %p2350_p5 = scmp.ne.s32.totalorder %s2796_s13, %s2349_s10  ;;  %p2356_p4 = scmp.lt.u32.totalorder %s2354_s22, %s2349_s10 }
  0x4e   : > { %s3272_s3 = scalar_select %p2809_p7, 1, 0 }
  0x4f   : > { %p2352_p9 = pnand %p2809_p7, %p2350_p5  ;;  %p2357_p6 = por %p2356_p4, %p2355_p2 }
  0x50   : > { %p2358_p8 = scmp.lt.u32.totalorder %s2349_s10, %s2796_s13 }
  0x51   : > { %p2353_p1 = pneg %p2352_p9 }
  0x52   : > { %p2359_p12 = por %p2358_p8, %p2357_p6 }
  0x54   : > { %p2360_p0 = pnand %p2359_p12, %p2353_p1 }
  0x56   : > { %2363 = shalt.err (!%p2360_p0)
}
  0x57   : > { %s2364_s17 = scalar_lea.vmem %s2799_s21, 128  ;;  %s2595_s12 = smov [#allocation7]  }
  0x58   : > { %p2365_p5 = scmp.ne.s32.totalorder %s2799_s21, %s2364_s17  ;;  %s2369_s11 = sshll.u32 %s2595_s12, 4  ;;  %s2370_s11 = int_to_ptr.vmem [resolvable:$false] %s2369_s11 }
  0x59   : > { %s2371_s20 = scalar_lea.vmem %s2370_s11, 256  ;;  %p2372_p11 = scmp.lt.s32.totalorder %s2799_s21, %s2370_s11 }
  0x5a   : > { %p2367_p9 = pnand %p2365_p5, %p2809_p7  ;;  %p2373_p13 = scmp.lt.s32.totalorder %s2371_s20, %s2364_s17 }
  0x5c   : > { %p2368_p10 = pneg %p2367_p9  ;;  %p2374_p2 = por %p2373_p13, %p2372_p11 }
  0x5e   : > { %p2375_p4 = pnand %p2374_p2, %p2368_p10 }
  0x60   : > { %2378 = shalt.err (!%p2375_p4)
}
  0x61   : > { %2218 = dma.hbm_to_vmem [thread:$0]  (!%p2787_p3), %s2796_s13, 128, %s2799_s21, %s2803_s24  }
  0x62   : > { %s2379_s16 = scalar_lea.hbm %s3217_s7, 256  ;;  %p3273_p11 = scmp.ne.s32.totalorder %s3264_s28, 0 }
  0x63   : > { %p2380_p1 = scmp.ne.s32.totalorder %s3217_s7, %s2379_s16  ;;  %p2386_p6 = scmp.lt.u32.totalorder %s2379_s16, %s3217_s7 }
  0x65   : > { %p2382_p13 = pnand %p2380_p1, %p3273_p11 }
  0x67   : > { %p2383_p10 = pneg %p2382_p13 }
  0x69   : > { %p2388_p8 = pnand %p2386_p6, %p2383_p10 }
  0x6b   : > { %2391 = shalt.err (!%p2388_p8)
}
  0x6c   : > { %s2392_s20 = scalar_lea.vmem %s360_s15, 256  ;;  %p2400_p9 = scmp.lt.s32.totalorder %s360_s15, %s360_s15 }
  0x6d   : > { %p2393_p12 = scmp.ne.s32.totalorder %s360_s15, %s2392_s20  ;;  %p2401_p2 = scmp.lt.s32.totalorder %s2392_s20, %s2392_s20 }
  0x6f   : > { %p2395_p0 = pnand %p2393_p12, %p3273_p11  ;;  %p2402_p4 = por %p2401_p2, %p2400_p9 }
  0x71   : > { %p2396_p5 = pneg %p2395_p0 }
  0x73   : > { %p2403_p3 = pnand %p2402_p4, %p2396_p5 }
  0x75   : > { %2406 = shalt.err (!%p2403_p3)
}
  0x76   : > { %p3274_p1 = scmp.ne.s32.totalorder %s3262_s30, 0  ;;  %s3275_s1 = smov 4  }
  0x77   : > { %s3276_s21 = smov 64   ;;  %s2596_s22 = smov [#allocation13]  }
  0x78   : > { %2208 = dma.hbm_to_vmem [thread:$0]  (!%p3274_p1), %s3217_s7, 256, %s360_s15, [#allocation11], %s3276_s21, %s3276_s21, %s3275_s1  }
  0x79   : > { %s373_s16 = sshll.u32 %s2596_s22, 4  ;;  %s2407_s11 = scalar_lea.hbm %s3218_s8, 16  ;;  %s374_s16 = int_to_ptr.vmem [resolvable:$true] %s373_s16 }
  0x7a   : > { %p2408_p3 = scmp.ne.s32.totalorder %s3218_s8, %s2407_s11  ;;  %p2414_p6 = scmp.lt.u32.totalorder %s2407_s11, %s3218_s8 }
  0x7c   : > { %p2410_p13 = pnand %p2408_p3, %p3273_p11 }
  0x7e   : > { %p2411_p10 = pneg %p2410_p13 }
  0x80   : > { %p2416_p8 = pnand %p2414_p6, %p2411_p10 }
  0x82   : > { %2419 = shalt.err (!%p2416_p8)
}
  0x83   : > { %s2420_s15 = scalar_lea.vmem %s374_s16, 16  ;;  %s2427_s1 = scalar_lea.vmem %s374_s16, 32 }
  0x84   : > { %p2421_p12 = scmp.ne.s32.totalorder %s374_s16, %s2420_s15  ;;  %p2428_p9 = scmp.lt.s32.totalorder %s374_s16, %s374_s16 }
  0x85   : > { %p2429_p2 = scmp.lt.s32.totalorder %s2427_s1, %s2420_s15 }
  0x86   : > { %p2423_p0 = pnand %p2421_p12, %p3273_p11 }
  0x87   : > { %p2430_p4 = por %p2429_p2, %p2428_p9 }
  0x88   : > { %p2424_p5 = pneg %p2423_p0 }
  0x8a   : > { %p2431_p7 = pnand %p2430_p4, %p2424_p5 }
  0x8c   : > { %2434 = shalt.err (!%p2431_p7)
}
  0x8d   : > { %2211 = dma.hbm_to_vmem [thread:$0]  (!%p3274_p1), %s3218_s8, 16, %s374_s16, [#allocation14]  }
  0x8e   : > { %s2877_s28 = scalar_lea.hbm %s3210_s0, %s2782_s26  ;;  %s394_s13 = scalar_lea.vmem [#allocation4], %s2779_s29 }
  0x8f   : > { %s402_s10 = sshll.u32 %s394_s13, 4  ;;  %s3277_s30 = sand.u32 1, %s2577_s19   ;;  %s403_s10 = int_to_ptr.vmem [resolvable:$true] %s402_s10 }
  0x90   : > { %s391_s22 = scalar_lea.sflag [#allocation5], %s3277_s30  ;;  %s2435_s12 = scalar_lea.hbm %s2877_s28, 128 }
  0x91   : > { %p2436_p7 = scmp.ne.s32.totalorder %s2877_s28, %s2435_s12  ;;  %p3278_p11 = scmp.ne.s32.totalorder %s3272_s3, 0 }
  0x92   : > { %s2440_s11 = scalar_lea.hbm %s3210_s0, 256  ;;  %p2441_p1 = scmp.lt.u32.totalorder %s2877_s28, %s3210_s0 }
  0x93   : > { %p2438_p3 = pnand %p2436_p7, %p3278_p11  ;;  %p2442_p10 = scmp.lt.u32.totalorder %s2440_s11, %s2435_s12 }
  0x94   : > { %p2444_p8 = scmp.lt.u32.totalorder %s2435_s12, %s2877_s28 }
  0x95   : > { %p2439_p13 = pneg %p2438_p3  ;;  %p2443_p6 = por %p2442_p10, %p2441_p1 }
  0x97   : > { %p2445_p12 = por %p2444_p8, %p2443_p6 }
  0x99   : > { %p2446_p0 = pnand %p2445_p12, %p2439_p13 }
  0x9b   : > { %2449 = shalt.err (!%p2446_p0)
}
  0x9c   : > { %s2450_s1 = scalar_lea.vmem %s403_s10, 128  ;;  %s2597_s9 = smov [#allocation4]  }
  0x9d   : > { %p2451_p5 = scmp.ne.s32.totalorder %s403_s10, %s2450_s1  ;;  %s2455_s21 = sshll.u32 %s2597_s9, 4  ;;  %s2456_s21 = int_to_ptr.vmem [resolvable:$false] %s2455_s21 }
  0x9e   : > { %s2457_s4 = scalar_lea.vmem %s2456_s21, 256  ;;  %p2458_p4 = scmp.lt.s32.totalorder %s403_s10, %s2456_s21 }
  0x9f   : > { %p2453_p9 = pnand %p2451_p5, %p3278_p11  ;;  %p2459_p7 = scmp.lt.s32.totalorder %s2457_s4, %s2450_s1 }
  0xa1   : > { %p2454_p2 = pneg %p2453_p9  ;;  %p2460_p3 = por %p2459_p7, %p2458_p4 }
  0xa3   : > { %p2461_p1 = pnand %p2460_p3, %p2454_p2 }
  0xa5   : > { %2464 = shalt.err (!%p2461_p1)
}
  0xa6   : > { %p3279_p10 = scmp.ne.s32.totalorder %s3270_s14, 0  ;;  %s2903_s30 = scalar_lea.hbm %s3212_s2, %s2782_s26 }
  0xa7   : > { %s431_s12 = scalar_lea.vmem [#allocation9], %s2779_s29  ;;  %s2465_s17 = scalar_lea.hbm %s2903_s30, 128 }
  0xa8   : > { %2215 = dma.hbm_to_vmem [thread:$0]  (!%p3279_p10), %s2877_s28, 128, %s403_s10, %s391_s22  }
  0xa9   : > { %s438_s16 = sshll.u32 %s431_s12, 4  ;;  %p2466_p13 = scmp.ne.s32.totalorder %s2903_s30, %s2465_s17  ;;  %s439_s16 = int_to_ptr.vmem [resolvable:$true] %s438_s16 }
  0xaa   : > { %s2470_s28 = scalar_lea.hbm %s3212_s2, 256  ;;  %p2471_p12 = scmp.lt.u32.totalorder %s2903_s30, %s3212_s2 }
  0xab   : > { %p2468_p6 = pnand %p2466_p13, %p3278_p11  ;;  %p2472_p0 = scmp.lt.u32.totalorder %s2470_s28, %s2465_s17 }
  0xac   : > { %p2474_p9 = scmp.lt.u32.totalorder %s2465_s17, %s2903_s30 }
  0xad   : > { %p2469_p8 = pneg %p2468_p6  ;;  %p2473_p5 = por %p2472_p0, %p2471_p12 }
  0xaf   : > { %p2475_p2 = por %p2474_p9, %p2473_p5 }
  0xb1   : > { %p2476_p4 = pnand %p2475_p2, %p2469_p8 }
  0xb3   : > { %2479 = shalt.err (!%p2476_p4)
}
  0xb4   : > { %s2480_s29 = scalar_lea.vmem %s439_s16, 128  ;;  %s2598_s26 = smov [#allocation9]  }
  0xb5   : > { %p2481_p7 = scmp.ne.s32.totalorder %s439_s16, %s2480_s29  ;;  %s2485_s15 = sshll.u32 %s2598_s26, 4  ;;  %s2486_s15 = int_to_ptr.vmem [resolvable:$false] %s2485_s15 }
  0xb6   : > { %s2487_s1 = scalar_lea.vmem %s2486_s15, 256  ;;  %p2488_p13 = scmp.lt.s32.totalorder %s439_s16, %s2486_s15 }
  0xb7   : > { %p2483_p3 = pnand %p2481_p7, %p3278_p11  ;;  %p2489_p6 = scmp.lt.s32.totalorder %s2487_s1, %s2480_s29 }
  0xb9   : > { %p2484_p1 = pneg %p2483_p3  ;;  %p2490_p10 = por %p2489_p6, %p2488_p13 }
  0xbb   : > { %p2491_p0 = pnand %p2490_p10, %p2484_p1 }
  0xbd   : > { %2494 = shalt.err (!%p2491_p0)
}
  0xbe   : > { %p3280_p12 = scmp.ne.s32.totalorder %s3270_s14, 0  ;;  %p3281_p8 = scmp.ne.s32.totalorder %s3261_s27, 0 }
  0xbf   : > { %s2927_s3 = sand.u32 (!%p3281_p8), 1, %s2573_s18   ;;  %p3282_p11 = scmp.ne.s32.totalorder (!%p3281_p8), %s3258_s25, 0 }
  0xc0   : > { %2221 = dma.hbm_to_vmem [thread:$0]  (!%p3280_p12), %s2903_s30, 128, %s439_s16, %s2803_s24  }
  0xc1   : > { %447 = sbr.rel (%p3281_p8) target bundleno = 1710 (0x6ae), region = 64  ;;  %s2930_s9 = sshll.u32 (!%p3281_p8), %s2927_s3, 3 }
  0xc2   : > { %s450_s21 = scalar_lea.sflag (!%p3281_p8), [#allocation5], %s2927_s3  ;;  %s453_s4 = scalar_lea.vmem (!%p3281_p8), [#allocation4], %s2930_s9 }
  0xc8   : > { %2548 = dma.done.wait (%p3282_p11), %s450_s21, 128  }
  0xc9   : > { %2550 = vsyncadd (%p3282_p11), %s450_s21, 4294967168  ;;  %s458_s27 = sand.u32 1, %s2701_s23   ;;  %s462_s24 = scalar_lea.vmem [#allocation7], %s2930_s9 }
  0xca   : > { %s459_s14 = scalar_lea.sflag [#allocation8], %s458_s27 }
  0xcb   : > { %2552 = dma.done.wait (%p3282_p11), %s459_s14, 256  }
  0xcc   : > { %2554 = vsyncadd (%p3282_p11), %s459_s14, 4294967040  ;;  %s471_s6 = scalar_lea.vmem [#allocation9], %s2930_s9  ;;  %p3283_p10 = scmp.eq.s32.totalorder %s2701_s23, 0 }
  0xce   : > { %2556 = dma.done.wait (%p3283_p10), [#allocation11], 512   ;;  %p3284_p5 = pmov %p3283_p10 }
  0xd0   : > { %2558 = vsyncadd (%p3284_p5), [#allocation11], 4294966784  ;;  %p3285_p9 = pmov %p3284_p5 }
  0xd1   : > { %p3286_p2 = pmov %p3284_p5 }
  0xd2   : > { %2560 = dma.done.wait (%p3285_p9), [#allocation14], 16  }
  0xd3   : > { %2562 = vsyncadd (%p3286_p2), [#allocation14], 4294967280  ;;  %v2599_v0 = vmov 0.0   ;;  %vm2600_vm0 = vmmov 0   ;;  %v2297_v1 = vld [vmem:[%s3215_s5] sm:$0xff]   ;;  %v2298_v2 = vld [vmem:[%s3215_s5 + $0x8] sm:$0xff]   ;;  %v689_v28 = vlaneseq }
  0xd4   : > { %2102 = vmatprep.subr.bf16.mxu0 %v2599_v0  ;;  %2106 = vmatprep.mubr.msk.bf16.mxu0 %vm2600_vm0, %v2599_v0  ;;  %v537_v3 = vld [vmem:[%s462_s24] sm:$0xff]  ;;  %vm564_vm1 = vcmask 261120   ;;  %v983_v7 = vld [vmem:[%s453_s4] sm:$0xff]  ;;  %s3287_s17 = sld [smem:[#allocation32_spill]]  ;;  %s2601_s11 = smov 104   ;;  %vm824_vm2 = vcmask 60416  }
  0xd5   : > { %2110 = vmatprep.subr.bf16.mxu1 %v2599_v0  ;;  %2114 = vmatprep.mubr.msk.bf16.mxu1 %vm2600_vm0, %v2599_v0  ;;  %v2299_v4 = vld [vmem:[#allocation10] sm:$0xff]   ;;  %v538_v5 = vpack.c.bf16 %v537_v3, %v537_v3  ;;  %v2300_v6 = vld [vmem:[#allocation10 + $0x8] sm:$0xff]   ;;  %v984_v8 = vpack.c.bf16 %v983_v7, %v983_v7  ;;  %s2602_s20 = smov 120   ;;  %s3288_s22 = sld [smem:[#allocation31_spill]]  ;;  %v2301_v19 = vld [vmem:[#allocation12] sm:$0xff]   ;;  %v690_v32 = vshrl.u32 %v689_v28, 7 }
  0xd6   : > { %2103 = vmatpush3.bf16.msra.mxu0 %v2297_v1  ;;  %s2603_s29 = smov 112   ;;  %2111 = vmatpush3.bf16.msra.mxu1 %v2301_v19  ;;  %v2302_v23 = vld [vmem:[#allocation12 + $0x8] sm:$0xff]   ;;  %v2604_v26 = vmov 1983009808   ;;  %v2605_v29 = vmov 1934713408  }
  0xd7   : > { %2104 = vmatprep.subr.bf16.mxu0 %v2599_v0  ;;  %2112 = vmatprep.subr.bf16.mxu1 %v2599_v0  ;;  %v539_v24 = vld [vmem:[%s471_s6] sm:$0xff]  ;;  %v687_v27 = vunpack.c.l.s4 %v2604_v26  ;;  %v719_v30 = vunpack.c.l.s4 %v2605_v29  ;;  %vm1211_vm3 = vcmask 64512   ;;  %vm1447_vm4 = vcmask 1043456   ;;  %s3289_s1 = sld [smem:[#allocation33_spill]]  ;;  %s2606_s27 = smov 16  }
  0xd8   : > { %v540_v25 = vpack.c.bf16 %v539_v24, %v539_v24  ;;  %s3290_s14 = sld [smem:[#allocation22_spill]]  ;;  %s2607_s24 = smov 8   ;;  %vm1778_vm5 = vcmask 130048   ;;  %vm1780_vm6 = vcmask 195584  }
  0xd9   : > { %v688_v31 = vunpack.c.0.s8 %v687_v27  ;;  %v720_v35 = vunpack.c.0.s8 %v719_v30  ;;  %s2608_s6 = smov 24   ;;  %s3291_s30 = sld [smem:[#allocation34_spill]] }
  0xda   : > { %2105 = vmatpush3.bf16.msra.mxu0 %v2298_v2  ;;  %v2038_v9 = vld [vmem:[%s3287_s17] ss:$0 sm:$0xff]  ;;  %2113 = vmatpush3.bf16.msra.mxu1 %v2302_v23  ;;  %s3292_s23 = sld [smem:[#allocation27_spill]]  ;;  %s531_s16 = scalar_lea.vmem [#allocation15], %s2930_s9 }
  0xdb   : > { %2118 = vmatprep.subr.bf16.mxu0 %v2599_v0  ;;  %v2050_v15 = vld [vmem:[%s3288_s22] ss:$0 sm:$0xff]  ;;  %2126 = vmatprep.subr.bf16.mxu1 %v2599_v0  ;;  %v3001_v36 = vsub.s32 %v688_v31, %v690_v32  ;;  %v3003_v42 = vsub.s32 %v720_v35, %v690_v32  ;;  %s1865_s17 = sshll.u32 %s531_s16, 4  ;;  %s3293_s28 = sld [smem:[#allocation35_spill]]  ;;  %s3162_s17 = int_to_ptr.vmem [resolvable:$true] %s1865_s17 }
  0xdc   : > { %s1851_s22 = scalar_lea.sflag [#allocation6], %s2927_s3  ;;  %s2495_s9 = scalar_lea.vmem %s3162_s17, 128 }
  0xdd   : > { %2107 = vmatmul.mubr.msk.bf16.vlgmr.msra.gmra.mrb[0].mxu0 %vm564_vm1, %v538_v5  ;;  %2115 = vmatmul.mubr.msk.bf16.vlgmr.msra.gmra.mrb[0].mxu1 %vm564_vm1, %v540_v25  ;;  %p2496_p4 = scmp.ne.s32.totalorder %s3162_s17, %s2495_s9 }
  0xde   : > { %2119 = vmatpush3.bf16.msra.mxu0 %v2299_v4  ;;  %2122 = vmatprep.mubr.msk.bf16.mxu0 %vm2600_vm0, %v2599_v0  ;;  %s2071_s12 = sshll.u32 %s3290_s14, 7 }
  0xdf   : > { %2120 = vmatprep.subr.bf16.mxu0 %v2599_v0  ;;  %2128 = vmatprep.mubr.msk.bf16.mxu1 %vm2600_vm0, %v2599_v0 }
  0xe0   : > { %p3294_p7 = scmp.ne.s32.totalorder %s3292_s23, 0 }
  0xe1   : > { %s3160_s10 = scalar_lea.hbm %s3293_s28, %s2071_s12 }
  0xe2   : > { %2121 = vmatpush3.bf16.msra.mxu0 %v2300_v6  ;;  %p2497_p3 = pnand %p2496_p4, %p3294_p7 }
  0xe3   : > { %2132 = vmatprep.subr.bf16.mxu0 %v2599_v0 }
  0xe4   : > { %p2498_p1 = pneg %p2497_p3 }
  0xe5   : > { %2123 = vmatmul.mubr.msk.bf16.vlgmr.msra.gmra.mrb[4].mxu0 %vm564_vm1, %v984_v8 }
  0xe6   : > { %2134 = vmatprep.mubr.msk.bf16.mxu0 %vm2600_vm0, %v2599_v0 }
 0x1b0   : > { %v602_v10 = vpop.f32.mrb[0].mxu0 }
 0x1b1   : > { %v603_v11 = vadd.f32 %v2038_v9, %v602_v10  ;;  %v2108_v12 = vpop.f32.mrb[1].mxu0 }
 0x1b2   : > { %v605_v13 = vpop.f32.mrb[2].mxu0 }
 0x1b3   : > { %681 = vrot.lane.b32.xlu1 %v603_v11, %s2601_s11  ;;  %675 = vrot.lane.b32.xlu0 %v603_v11, %s2602_s20  ;;  %v2109_v14 = vpop.f32.mrb[3].mxu0 }
 0x1b7   : > { %678 = vrot.lane.b32.xlu0 %v603_v11, %s2603_s29 }
 0x1b8   : > { %v1046_v16 = vpop.f32.mrb[4].mxu0 }
 0x1b9   : > { %v1047_v17 = vadd.f32 %v2050_v15, %v1046_v16  ;;  %v2124_v18 = vpop.f32.mrb[5].mxu0 }
 0x1ba   : > { %v1049_v20 = vpop.f32.mrb[6].mxu0 }
 0x1bb   : > { %v2986_v21 = vmul.f32 0.35355338, %v1047_v17  ;;  %v2125_v22 = vpop.f32.mrb[7].mxu0 }
 0x1bd   : > { %1057 = vrot.lane.b32.xlu0 %v2986_v21, %s2603_s29  ;;  %1054 = vrot.lane.b32.xlu1 %v2986_v21, %s2602_s20 }
 0x1c1   : > { %1060 = vrot.lane.b32.xlu1 %v2986_v21, %s2601_s11 }
 0x225   : > { %v682_v33 = vpop.permute.xlu1 %681  ;;  %v676_v34 = vpop.permute.xlu0 %675 }
 0x226   : > { %v700_v37 = vcombine.low %v676_v34, %v682_v33  ;;  %v701_v38 = vcombine.high %v676_v34, %v682_v33 }
 0x228   : > { %v708_v43 = vrot.slane %v700_v37, %v3001_v36  ;;  %v715_v44 = vrot.slane %v701_v38, %v3001_v36 }
 0x229   : > { %v679_v39 = vpop.permute.xlu0 %678 }
 0x22a   : > { %v684_v40 = vcombine.low %v603_v11, %v679_v39  ;;  %v685_v41 = vcombine.high %v603_v11, %v679_v39 }
 0x22c   : > { %v692_v45 = vrot.slane %v684_v40, %v3001_v36  ;;  %v699_v46 = vrot.slane %v685_v41, %v3001_v36 }
 0x22e   : > { %v716_v47 = vcombine.low %v692_v45, %v708_v43  ;;  %v717_v48 = vcombine.high %v692_v45, %v708_v43  ;;  %v732_v49 = vcombine.low %v699_v46, %v715_v44  ;;  %v733_v50 = vcombine.high %v699_v46, %v715_v44 }
 0x22f   : > { %v1055_v51 = vpop.permute.xlu1 %1054  ;;  %v1058_v56 = vpop.permute.xlu0 %1057 }
 0x230   : > { %v724_v52 = vrot.slane %v716_v47, %v3003_v42  ;;  %v731_v53 = vrot.slane %v717_v48, %v3003_v42  ;;  %v740_v54 = vrot.slane %v732_v49, %v3003_v42  ;;  %v747_v55 = vrot.slane %v733_v50, %v3003_v42 }
 0x231   : > { %v1063_v61 = vcombine.low %v2986_v21, %v1058_v56  ;;  %v1064_v62 = vcombine.high %v2986_v21, %v1058_v56 }
 0x232   : > { %v752_v57 = vcombine.low %v724_v52, %v731_v53  ;;  %v2046_v58 = vcombine.high %v724_v52, %v731_v53  ;;  %v768_v59 = vcombine.low %v740_v54, %v747_v55  ;;  %v2047_v60 = vcombine.high %v740_v54, %v747_v55 }
 0x233   : > { %v1061_v63 = vpop.permute.xlu1 %1060  ;;  %v1071_v11 = vrot.slane %v1063_v61, %v3001_v36  ;;  %v1078_v12 = vrot.slane %v1064_v62, %v3001_v36 }
 0x234   : > { %v759_v1 = vrot.slane %v752_v57, %v3001_v36  ;;  %v767_v2 = vrot.slane %v2046_v58, %v3001_v36  ;;  %v775_v3 = vrot.slane %v768_v59, %v3001_v36  ;;  %v783_v4 = vrot.slane %v2047_v60, %v3001_v36 }
 0x235   : > { %v1079_v5 = vcombine.low %v1055_v51, %v1061_v63  ;;  %v1080_v6 = vcombine.high %v1055_v51, %v1061_v63 }
 0x236   : > { %v784_v7 = vcombine.low %v759_v1, %v767_v2  ;;  %v785_v8 = vcombine.high %v759_v1, %v767_v2  ;;  %v800_v9 = vcombine.low %v775_v3, %v783_v4  ;;  %v801_v10 = vcombine.high %v775_v3, %v783_v4 }
 0x237   : > { %v1087_v13 = vrot.slane %v1079_v5, %v3001_v36  ;;  %v1094_v14 = vrot.slane %v1080_v6, %v3001_v36  ;;  %v668_v6 = vpop.f32.mrb[0].mxu1 }
 0x238   : > { %v792_v15 = vrot.slane %v784_v7, %v3003_v42  ;;  %v799_v16 = vrot.slane %v785_v8, %v3003_v42  ;;  %v808_v17 = vrot.slane %v800_v9, %v3003_v42  ;;  %v815_v18 = vrot.slane %v801_v10, %v3003_v42  ;;  %v2116_v7 = vpop.f32.mrb[1].mxu1 }
 0x239   : > { %v1095_v19 = vcombine.low %v1071_v11, %v1087_v13  ;;  %v1096_v20 = vcombine.high %v1071_v11, %v1087_v13  ;;  %v1111_v21 = vcombine.low %v1078_v12, %v1094_v14  ;;  %v1112_v22 = vcombine.high %v1078_v12, %v1094_v14  ;;  %v671_v8 = vpop.f32.mrb[2].mxu1 }
 0x23a   : > { %v816_v23 = vcombine.low %v792_v15, %v808_v17  ;;  %v817_v24 = vcombine.high %v792_v15, %v808_v17  ;;  %v818_v25 = vcombine.low %v799_v16, %v815_v18  ;;  %v819_v26 = vcombine.high %v799_v16, %v815_v18  ;;  %v2117_v9 = vpop.f32.mrb[3].mxu1 }
 0x23b   : > { %v1103_v27 = vrot.slane %v1095_v19, %v3003_v42  ;;  %v1110_v28 = vrot.slane %v1096_v20, %v3003_v42  ;;  %v1119_v29 = vrot.slane %v1111_v21, %v3003_v42  ;;  %v1126_v30 = vrot.slane %v1112_v22, %v3003_v42 }
 0x23c   : > { %v820_v31 = vpack.c.bf16 %v816_v23, %v816_v23  ;;  %v821_v32 = vpack.c.bf16 %v817_v24, %v817_v24  ;;  %v822_v33 = vpack.c.bf16 %v818_v25, %v818_v25  ;;  %v823_v34 = vpack.c.bf16 %v819_v26, %v819_v26 }
 0x23d   : > { %v1131_v35 = vcombine.low %v1103_v27, %v1110_v28  ;;  %v2054_v37 = vcombine.high %v1103_v27, %v1110_v28  ;;  %v1147_v38 = vcombine.low %v1119_v29, %v1126_v30  ;;  %v2055_v39 = vcombine.high %v1119_v29, %v1126_v30  ;;  %v2042_v30 = vld [vmem:[#allocation13] ss:$0 sm:$0xff] }
 0x23e   : > { %825 = vst.msk [vmem:[#allocation2] sm:$0xf] %vm824_vm2, %v820_v31  ;;  %826 = vst.msk [vmem:[#allocation2 + $0x4] sm:$0xf] %vm824_vm2, %v821_v32  ;;  %v669_v31 = vadd.f32 %v2042_v30, %v668_v6 }
 0x23f   : > { %827 = vst.msk [vmem:[#allocation2 + $0x8] sm:$0xf] %vm824_vm2, %v822_v33  ;;  %828 = vst.msk [vmem:[#allocation2 + $0xc] sm:$0xf] %vm824_vm2, %v823_v34  ;;  %v1138_v40 = vrot.slane %v1131_v35, %v3001_v36  ;;  %v1146_v41 = vrot.slane %v2054_v37, %v3001_v36  ;;  %v1154_v43 = vrot.slane %v1147_v38, %v3001_v36 }
 0x240   : > { %v1162_v44 = vrot.slane %v2055_v39, %v3001_v36 }
 0x241   : > { %v1163_v45 = vcombine.low %v1138_v40, %v1146_v41  ;;  %v1164_v53 = vcombine.high %v1138_v40, %v1146_v41 }
 0x242   : > { %v1179_v46 = vcombine.low %v1154_v43, %v1162_v44  ;;  %v1180_v54 = vcombine.high %v1154_v43, %v1162_v44 }
 0x243   : > { %v1171_v47 = vrot.slane %v1163_v45, %v3003_v42  ;;  %v1178_v61 = vrot.slane %v1164_v53, %v3003_v42 }
 0x244   : > { %v1187_v48 = vrot.slane %v1179_v46, %v3003_v42  ;;  %v1194_v62 = vrot.slane %v1180_v54, %v3003_v42 }
 0x245   : > { %v1203_v49 = vld [vmem:[#allocation2] sm:$0xf]  ;;  %v1204_v50 = vld [vmem:[#allocation2 + $0x4] sm:$0xf] }
 0x246   : > { %v1216_v51 = vsel %vm1211_vm3, %v1203_v49, 0  ;;  %v1262_v52 = vsel %vm1211_vm3, %v1204_v50, 0  ;;  %v1195_v55 = vcombine.low %v1171_v47, %v1187_v48  ;;  %v1196_v56 = vcombine.high %v1171_v47, %v1187_v48  ;;  %v1205_v57 = vld [vmem:[#allocation2 + $0x8] sm:$0xf]  ;;  %v1206_v58 = vld [vmem:[#allocation2 + $0xc] sm:$0xf] }
 0x247   : > { %2127 = vmatpush3.bf16.xpose.msra.mxu1 %v1216_v51  ;;  %2133 = vmatpush3.bf16.xpose.msra.mxu0 %v1262_v52  ;;  %v1308_v63 = vsel %vm1211_vm3, %v1205_v57, 0  ;;  %v1354_v1 = vsel %vm1211_vm3, %v1206_v58, 0  ;;  %v1197_v2 = vcombine.low %v1178_v61, %v1194_v62  ;;  %v1198_v3 = vcombine.high %v1178_v61, %v1194_v62 }
 0x248   : > { %2138 = vmatprep.subr.bf16.mxu1 %v2599_v0  ;;  %2144 = vmatprep.subr.bf16.mxu0 %v2599_v0  ;;  %v1199_v59 = vpack.c.bf16 %v1195_v55, %v1195_v55  ;;  %v1200_v60 = vpack.c.bf16 %v1196_v56, %v1196_v56 }
 0x249   : > { %v1201_v4 = vpack.c.bf16 %v1197_v2, %v1197_v2  ;;  %v1202_v5 = vpack.c.bf16 %v1198_v3, %v1198_v3 }
 0x24e   : > { %2129 = vmatmul.mubr.msk.bf16.vlgmr.msra.gmra.mrb[4].mxu1 %vm1211_vm3, %v1199_v59  ;;  %2135 = vmatmul.mubr.msk.bf16.vlgmr.msra.gmra.mrb[8].mxu0 %vm1211_vm3, %v1200_v60 }
 0x24f   : > { %2139 = vmatpush3.bf16.xpose.msra.mxu1 %v1308_v63  ;;  %2145 = vmatpush3.bf16.xpose.msra.mxu0 %v1354_v1 }
 0x250   : > { %2140 = vmatprep.mubr.msk.bf16.mxu1 %vm2600_vm0, %v2599_v0  ;;  %2146 = vmatprep.mubr.msk.bf16.mxu0 %vm2600_vm0, %v2599_v0 }
 0x251   : > { %2150 = vmatprep.subr.bf16.mxu1 %v2599_v0  ;;  %2156 = vmatprep.subr.bf16.mxu0 %v2599_v0 }
 0x256   : > { %2141 = vmatmul.mubr.msk.bf16.vlgmr.msra.gmra.mrb[8].mxu1 %vm1211_vm3, %v1201_v4  ;;  %2147 = vmatmul.mubr.msk.bf16.vlgmr.msra.gmra.mrb[12].mxu0 %vm1211_vm3, %v1202_v5 }
 0x257   : > { %2152 = vmatprep.mubr.msk.bf16.mxu1 %vm2600_vm0, %v2599_v0  ;;  %2158 = vmatprep.mubr.msk.bf16.mxu0 %vm2600_vm0, %v2599_v0 }
 0x321   : > { %v1252_v10 = vpop.f32.mrb[4].mxu1  ;;  %v1298_v11 = vpop.f32.mrb[8].mxu0 }
 0x322   : > { %v2130_v12 = vpop.f32.mrb[5].mxu1  ;;  %v2136_v13 = vpop.f32.mrb[9].mxu0  ;;  %v1396_v14 = vsel %vm1211_vm3, %v1252_v10, -inf  ;;  %v1399_v15 = vsel %vm1211_vm3, %v1298_v11, -inf }
 0x323   : > { %1397 = vmax.xlane.f32.xlu0 %v1396_v14  ;;  %v1255_v16 = vpop.f32.mrb[6].mxu1  ;;  %1400 = vmax.xlane.f32.xlu1 %v1399_v15  ;;  %v1301_v17 = vpop.f32.mrb[10].mxu0 }
 0x324   : > { %v2131_v18 = vpop.f32.mrb[7].mxu1  ;;  %v2137_v19 = vpop.f32.mrb[11].mxu0 }
 0x329   : > { %v1344_v20 = vpop.f32.mrb[8].mxu1  ;;  %v1390_v21 = vpop.f32.mrb[12].mxu0 }
 0x32a   : > { %v2142_v22 = vpop.f32.mrb[9].mxu1  ;;  %v2148_v23 = vpop.f32.mrb[13].mxu0  ;;  %v1402_v24 = vsel %vm1211_vm3, %v1344_v20, -inf  ;;  %v1405_v29 = vsel %vm1211_vm3, %v1390_v21, -inf }
 0x32b   : > { %1403 = vmax.xlane.f32.xlu0 %v1402_v24  ;;  %v1347_v25 = vpop.f32.mrb[10].mxu1  ;;  %v1393_v26 = vpop.f32.mrb[14].mxu0 }
 0x32c   : > { %v2143_v27 = vpop.f32.mrb[11].mxu1  ;;  %v2149_v28 = vpop.f32.mrb[15].mxu0 }
 0x32f   : > { %1406 = vmax.xlane.f32.xlu0 %v1405_v29 }
 0x334   : > { %830 = vrot.lane.b32.xlu1 %v669_v31, %s2602_s20 }
 0x338   : > { %836 = vrot.lane.b32.xlu1 %v669_v31, %s2601_s11 }
 0x345   : > { %833 = vrot.lane.b32.xlu0 %v669_v31, %s2603_s29  ;;  %s2609_s29 = smov [#allocation15]  }
 0x346   : > { %s2499_s26 = sshll.u32 %s2609_s29, 4  ;;  %s2500_s26 = int_to_ptr.vmem [resolvable:$false] %s2499_s26 }
 0x347   : > { %s2501_s15 = scalar_lea.vmem %s2500_s26, 256  ;;  %p2502_p13 = scmp.lt.s32.totalorder %s3162_s17, %s2500_s26 }
 0x348   : > { %p2503_p6 = scmp.lt.s32.totalorder %s2501_s15, %s2495_s9 }
 0x34a   : > { %p2504_p0 = por %p2503_p6, %p2502_p13 }
 0x34c   : > { %p2505_p12 = pnand %p2504_p0, %p2498_p1 }
 0x3b0   : > { %v1398_v32 = vpop.xlane.xlu0 %1397  ;;  %v1401_v33 = vpop.xlane.xlu1 %1400 }
 0x3b1   : > { %v1408_v34 = vsub.f32 %v1252_v10, %v1398_v32  ;;  %v1409_v35 = vsub.f32 %v1298_v11, %v1401_v33 }
 0x3b3   : > { %v1412_v37 = vmul.f32 1.442695, %v1408_v34  ;;  %v1414_v38 = vmul.f32 1.442695, %v1409_v35 }
 0x3b4   : > { %v831_v39 = vpop.permute.xlu1 %830 }
 0x3b5   : > { %2305 = vpow2.f32 %v1412_v37 }
 0x3b6   : > { %2307 = vpow2.f32 %v1414_v38 }
 0x3b8   : > { %v1404_v40 = vpop.xlane.xlu0 %1403  ;;  %v837_v44 = vpop.permute.xlu1 %836 }
 0x3b9   : > { %v1410_v41 = vsub.f32 %v1344_v20, %v1404_v40  ;;  %v855_v48 = vcombine.low %v831_v39, %v837_v44  ;;  %v856_v49 = vcombine.high %v831_v39, %v837_v44 }
 0x3bb   : > { %v1416_v43 = vmul.f32 1.442695, %v1410_v41  ;;  %v863_v57 = vrot.slane %v855_v48, %v3001_v36  ;;  %v870_v58 = vrot.slane %v856_v49, %v3001_v36 }
 0x3bc   : > { %v1407_v45 = vpop.xlane.xlu0 %1406 }
 0x3bd   : > { %2309 = vpow2.f32 %v1416_v43  ;;  %v1411_v46 = vsub.f32 %v1390_v21, %v1407_v45 }
 0x3bf   : > { %v3070_v47 = vpop.eup %2305  ;;  %v1418_v50 = vmul.f32 1.442695, %v1411_v46 }
 0x3c0   : > { %v3072_v51 = vpop.eup %2307  ;;  %v834_v52 = vpop.permute.xlu0 %833  ;;  %v1420_v53 = vsel %vm1211_vm3, %v3070_v47, 0.0 }
 0x3c1   : > { %2311 = vpow2.f32 %v1418_v50  ;;  %v839_v54 = vcombine.low %v669_v31, %v834_v52  ;;  %v840_v55 = vcombine.high %v669_v31, %v834_v52  ;;  %1421 = vadd.xlane.f32.xlu1 %v1420_v53  ;;  %v1423_v56 = vsel %vm1211_vm3, %v3072_v51, 0.0 }
 0x3c2   : > { %1424 = vadd.xlane.f32.xlu0 %v1423_v56 }
 0x3c3   : > { %v847_v59 = vrot.slane %v839_v54, %v3001_v36  ;;  %v854_v60 = vrot.slane %v840_v55, %v3001_v36 }
 0x3c5   : > { %v871_v61 = vcombine.low %v847_v59, %v863_v57  ;;  %v872_v62 = vcombine.high %v847_v59, %v863_v57  ;;  %v887_v63 = vcombine.low %v854_v60, %v870_v58  ;;  %v888_v1 = vcombine.high %v854_v60, %v870_v58 }
 0x3c7   : > { %v3082_v2 = vpop.eup %2309  ;;  %v879_v3 = vrot.slane %v871_v61, %v3003_v42  ;;  %v886_v4 = vrot.slane %v872_v62, %v3003_v42  ;;  %v895_v5 = vrot.slane %v887_v63, %v3003_v42  ;;  %v902_v6 = vrot.slane %v888_v1, %v3003_v42 }
 0x3c8   : > { %v1426_v7 = vsel %vm1211_vm3, %v3082_v2, 0.0 }
 0x3c9   : > { %v907_v8 = vcombine.low %v879_v3, %v886_v4  ;;  %v2048_v9 = vcombine.high %v879_v3, %v886_v4  ;;  %v923_v10 = vcombine.low %v895_v5, %v902_v6  ;;  %v2049_v11 = vcombine.high %v895_v5, %v902_v6  ;;  %1427 = vadd.xlane.f32.xlu0 %v1426_v7 }
 0x3cb   : > { %v3090_v12 = vpop.eup %2311  ;;  %v914_v13 = vrot.slane %v907_v8, %v3001_v36  ;;  %v922_v14 = vrot.slane %v2048_v9, %v3001_v36  ;;  %v930_v15 = vrot.slane %v923_v10, %v3001_v36  ;;  %v938_v16 = vrot.slane %v2049_v11, %v3001_v36 }
 0x3cc   : > { %v1429_v17 = vsel %vm1211_vm3, %v3090_v12, 0.0 }
 0x3cd   : > { %v939_v18 = vcombine.low %v914_v13, %v922_v14  ;;  %v940_v19 = vcombine.high %v914_v13, %v922_v14  ;;  %v955_v20 = vcombine.low %v930_v15, %v938_v16  ;;  %v956_v21 = vcombine.high %v930_v15, %v938_v16  ;;  %1430 = vadd.xlane.f32.xlu1 %v1429_v17 }
 0x3cf   : > { %v947_v22 = vrot.slane %v939_v18, %v3003_v42  ;;  %v954_v23 = vrot.slane %v940_v19, %v3003_v42  ;;  %v963_v24 = vrot.slane %v955_v20, %v3003_v42  ;;  %v970_v25 = vrot.slane %v956_v21, %v3003_v42 }
 0x3d1   : > { %v971_v26 = vcombine.low %v947_v22, %v963_v24  ;;  %v972_v27 = vcombine.high %v947_v22, %v963_v24  ;;  %v973_v28 = vcombine.low %v954_v23, %v970_v25  ;;  %v974_v29 = vcombine.high %v954_v23, %v970_v25  ;;  %v2303_v25 = vld [vmem:[%s3289_s1] sm:$0xff]  }
 0x3d3   : > { %v975_v30 = vpack.c.bf16 %v971_v26, %v971_v26  ;;  %v976_v31 = vpack.c.bf16 %v972_v27, %v972_v27  ;;  %v977_v32 = vpack.c.bf16 %v973_v28, %v973_v28  ;;  %v978_v33 = vpack.c.bf16 %v974_v29, %v974_v29 }
 0x3d5   : > { %979 = vst.msk [vmem:[#allocation3] sm:$0xf] %vm824_vm2, %v975_v30  ;;  %980 = vst.msk [vmem:[#allocation3 + $0x4] sm:$0xf] %vm824_vm2, %v976_v31 }
 0x3d6   : > { %981 = vst.msk [vmem:[#allocation3 + $0x8] sm:$0xf] %vm824_vm2, %v977_v32  ;;  %982 = vst.msk [vmem:[#allocation3 + $0xc] sm:$0xf] %vm824_vm2, %v978_v33 }
 0x3dc   : > { %v1207_v34 = vld [vmem:[#allocation3] sm:$0xf]  ;;  %v1208_v35 = vld [vmem:[#allocation3 + $0x4] sm:$0xf] }
 0x3dd   : > { %v1449_v37 = vsel %vm1447_vm4, %v1207_v34, 0  ;;  %v1495_v38 = vsel %vm1447_vm4, %v1208_v35, 0  ;;  %v1209_v49 = vld [vmem:[#allocation3 + $0x8] sm:$0xf]  ;;  %v1210_v52 = vld [vmem:[#allocation3 + $0xc] sm:$0xf] }
 0x3de   : > { %2151 = vmatpush3.bf16.msra.mxu1 %v1449_v37  ;;  %2157 = vmatpush3.bf16.msra.mxu0 %v1495_v38  ;;  %v1541_v54 = vsel %vm1447_vm4, %v1209_v49, 0  ;;  %v1587_v55 = vsel %vm1447_vm4, %v1210_v52, 0  ;;  %v2304_v34 = vld [vmem:[%s3289_s1 + $0x8] sm:$0xff]  }
 0x3df   : > { %2162 = vmatprep.subr.bf16.mxu1 %v2599_v0  ;;  %2168 = vmatprep.subr.bf16.mxu0 %v2599_v0 }
 0x44e   : > { %v1422_v39 = vpop.xlane.xlu1 %1421 }
 0x44f   : > { %2313 = vrcp.f32 %v1422_v39  ;;  %v1425_v40 = vpop.xlane.xlu0 %1424 }
 0x450   : > { %2315 = vrcp.f32 %v1425_v40 }
 0x456   : > { %v1428_v41 = vpop.xlane.xlu0 %1427 }
 0x457   : > { %2317 = vrcp.f32 %v1428_v41 }
 0x459   : > { %v2314_v43 = vpop.eup %2313 }
 0x45a   : > { %v2316_v44 = vpop.eup %2315  ;;  %v1436_v45 = vmul.f32 %v2314_v43, %v3070_v47  ;;  %v1431_v46 = vpop.xlane.xlu1 %1430 }
 0x45b   : > { %v1437_v48 = vmul.f32 %v2316_v44, %v3072_v51  ;;  %2319 = vrcp.f32 %v1431_v46 }
 0x45c   : > { %v1440_v50 = vpack.c.bf16 %v1436_v45, %v1436_v45 }
 0x45d   : > { %v1441_v53 = vpack.c.bf16 %v1437_v48, %v1437_v48 }
 0x45e   : > { %2153 = vmatmul.mubr.msk.bf16.vlgmr.msra.gmra.mrb[12].mxu1 %vm1211_vm3, %v1440_v50 }
 0x45f   : > { %2159 = vmatmul.mubr.msk.bf16.vlgmr.msra.gmra.mrb[16].mxu0 %vm1211_vm3, %v1441_v53  ;;  %2163 = vmatpush3.bf16.msra.mxu1 %v1541_v54 }
 0x460   : > { %2169 = vmatpush3.bf16.msra.mxu0 %v1587_v55  ;;  %2164 = vmatprep.mubr.msk.bf16.mxu1 %vm2600_vm0, %v2599_v0 }
 0x461   : > { %v2318_v47 = vpop.eup %2317  ;;  %2170 = vmatprep.mubr.msk.bf16.mxu0 %vm2600_vm0, %v2599_v0  ;;  %2174 = vmatprep.subr.bf16.mxu1 %v2599_v0 }
 0x462   : > { %v1438_v51 = vmul.f32 %v2318_v47, %v3082_v2 }
 0x464   : > { %v1442_v56 = vpack.c.bf16 %v1438_v51, %v1438_v51 }
 0x465   : > { %v2320_v57 = vpop.eup %2319 }
 0x466   : > { %v1439_v58 = vmul.f32 %v2320_v57, %v3090_v12  ;;  %2165 = vmatmul.mubr.msk.bf16.vlgmr.msra.gmra.mrb[16].mxu1 %vm1211_vm3, %v1442_v56  ;;  %v2066_v57 = vld [vmem:[%s3291_s30] ss:$0 sm:$0xff] }
 0x467   : > { %2178 = vmatprep.mubr.msk.bf16.mxu1 %vm2600_vm0, %v2599_v0  ;;  %2175 = vmatpush3.bf16.msra.mxu1 %v2303_v25 }
 0x468   : > { %v1443_v59 = vpack.c.bf16 %v1439_v58, %v1439_v58  ;;  %2176 = vmatprep.subr.bf16.mxu1 %v2599_v0 }
 0x46a   : > { %2171 = vmatmul.mubr.msk.bf16.vlgmr.msra.gmra.mrb[20].mxu0 %vm1211_vm3, %v1443_v59 }
 0x46b   : > { %2177 = vmatpush3.bf16.msra.mxu1 %v2304_v34 }
 0x531   : > { %v1485_v60 = vpop.f32.mrb[12].mxu1 }
 0x532   : > { %v1531_v61 = vpop.f32.mrb[16].mxu0  ;;  %v2154_v62 = vpop.f32.mrb[13].mxu1 }
 0x533   : > { %v2160_v63 = vpop.f32.mrb[17].mxu0  ;;  %v1488_v1 = vpop.f32.mrb[14].mxu1 }
 0x534   : > { %v1534_v3 = vpop.f32.mrb[18].mxu0  ;;  %v2155_v4 = vpop.f32.mrb[15].mxu1 }
 0x535   : > { %v2161_v2 = vpop.f32.mrb[19].mxu0 }
 0x539   : > { %v1577_v5 = vpop.f32.mrb[16].mxu1 }
 0x53a   : > { %v1629_v6 = vcombine.low %v1485_v60, %v1577_v5  ;;  %v1630_v7 = vcombine.high %v1485_v60, %v1577_v5  ;;  %v2166_v8 = vpop.f32.mrb[17].mxu1 }
 0x53b   : > { %v1580_v9 = vpop.f32.mrb[18].mxu1 }
 0x53c   : > { %v2167_v10 = vpop.f32.mrb[19].mxu1  ;;  %v1637_v16 = vrot.slane %v1629_v6, %v3001_v36  ;;  %v1644_v17 = vrot.slane %v1630_v7, %v3001_v36 }
 0x53d   : > { %v1623_v11 = vpop.f32.mrb[20].mxu0 }
 0x53e   : > { %v1645_v12 = vcombine.low %v1531_v61, %v1623_v11  ;;  %v1646_v13 = vcombine.high %v1531_v61, %v1623_v11  ;;  %v2172_v14 = vpop.f32.mrb[21].mxu0 }
 0x53f   : > { %v1626_v15 = vpop.f32.mrb[22].mxu0 }
 0x540   : > { %v1653_v18 = vrot.slane %v1645_v12, %v3001_v36  ;;  %v1660_v19 = vrot.slane %v1646_v13, %v3001_v36  ;;  %v2173_v20 = vpop.f32.mrb[23].mxu0 }
 0x542   : > { %v1661_v21 = vcombine.low %v1637_v16, %v1653_v18  ;;  %v1662_v22 = vcombine.high %v1637_v16, %v1653_v18  ;;  %v1677_v23 = vcombine.low %v1644_v17, %v1660_v19  ;;  %v1678_v24 = vcombine.high %v1644_v17, %v1660_v19 }
 0x544   : > { %v1669_v26 = vrot.slane %v1661_v21, %v3003_v42  ;;  %v1676_v27 = vrot.slane %v1662_v22, %v3003_v42  ;;  %v1685_v28 = vrot.slane %v1677_v23, %v3003_v42  ;;  %v1692_v29 = vrot.slane %v1678_v24, %v3003_v42 }
 0x546   : > { %v1697_v30 = vcombine.low %v1669_v26, %v1676_v27  ;;  %v2064_v31 = vcombine.high %v1669_v26, %v1676_v27  ;;  %v1713_v32 = vcombine.low %v1685_v28, %v1692_v29  ;;  %v2065_v33 = vcombine.high %v1685_v28, %v1692_v29 }
 0x548   : > { %v1704_v35 = vrot.slane %v1697_v30, %v3001_v36  ;;  %v1712_v37 = vrot.slane %v2064_v31, %v3001_v36  ;;  %v1720_v38 = vrot.slane %v1713_v32, %v3001_v36  ;;  %v1728_v39 = vrot.slane %v2065_v33, %v3001_v36 }
 0x54a   : > { %v1730_v40 = vcombine.high %v1704_v35, %v1712_v37  ;;  %v1746_v41 = vcombine.high %v1720_v38, %v1728_v39  ;;  %v1729_v43 = vcombine.low %v1704_v35, %v1712_v37  ;;  %v1745_v44 = vcombine.low %v1720_v38, %v1728_v39 }
 0x54c   : > { %v1744_v45 = vrot.slane %v1730_v40, %v3003_v42  ;;  %v1760_v0 = vrot.slane %v1746_v41, %v3003_v42  ;;  %v1737_v46 = vrot.slane %v1729_v43, %v3003_v42  ;;  %v1753_v48 = vrot.slane %v1745_v44, %v3003_v42 }
 0x54e   : > { %v1763_v49 = vcombine.low %v1744_v45, %v1760_v0  ;;  %v1762_v50 = vcombine.high %v1737_v46, %v1753_v48  ;;  %v1764_v52 = vcombine.high %v1744_v45, %v1760_v0  ;;  %v1761_v53 = vcombine.low %v1737_v46, %v1753_v48 }
 0x550   : > { %1770 = vrot.lane.b32.xlu1 %v1763_v49, %s2606_s27  ;;  %1766 = vrot.lane.b32.xlu0 %v1762_v50, %s2607_s24 }
 0x554   : > { %1774 = vrot.lane.b32.xlu1 %v1764_v52, %s2608_s6 }
 0x5c2   : > { %v1771_v36 = vpop.permute.xlu1 %1770  ;;  %v1767_v54 = vpop.permute.xlu0 %1766 }
 0x5c3   : > { %v1777_v55 = vsel %vm1211_vm3, %v1761_v53, %v1767_v54 }
 0x5c4   : > { %v1779_v42 = vsel %vm1778_vm5, %v1777_v55, %v1771_v36 }
 0x5c6   : > { %v1775_v47 = vpop.permute.xlu1 %1774 }
 0x5c7   : > { %v1781_v51 = vsel %vm1780_vm6, %v1779_v42, %v1775_v47 }
 0x5c8   : > { %v1782_v56 = vpack.c.bf16 %v1781_v51, %v1781_v51 }
 0x5ca   : > { %2179 = vmatmul.mubr.msk.bf16.vlgmr.msra.gmra.mrb[20].mxu1 %vm564_vm1, %v1782_v56 }
 0x69d   : > { %v1843_v58 = vpop.f32.mrb[20].mxu1 }
 0x69e   : > { %v1844_v59 = vadd.f32 %v2066_v57, %v1843_v58  ;;  %v2180_v60 = vpop.f32.mrb[21].mxu1 }
 0x69f   : > { %v1846_v61 = vpop.f32.mrb[22].mxu1 }
 0x6a0   : > { %v2181_v62 = vpop.f32.mrb[23].mxu1  ;;  %1849 = vst.msk [vmem:[%s531_s16] sm:$0xff] %vm564_vm1, %v1844_v59 }
 0x6a1   : > { %2508 = shalt.err (!%p2505_p12)
}
 0x6a2   : > { %s2509_s3 = scalar_lea.hbm %s3160_s10, 128  ;;  %s2513_s27 = scalar_lea.hbm %s3293_s28, 256 }
 0x6a3   : > { %p2510_p8 = scmp.ne.s32.totalorder %s3160_s10, %s2509_s3  ;;  %p2514_p5 = scmp.lt.u32.totalorder %s3160_s10, %s3293_s28 }
 0x6a4   : > { %p2515_p9 = scmp.lt.u32.totalorder %s2513_s27, %s2509_s3  ;;  %p2517_p4 = scmp.lt.u32.totalorder %s2509_s3, %s3160_s10 }
 0x6a5   : > { %p2511_p11 = pnand %p2510_p8, %p3294_p7 }
 0x6a6   : > { %p2516_p2 = por %p2515_p9, %p2514_p5 }
 0x6a7   : > { %p2512_p10 = pneg %p2511_p11 }
 0x6a8   : > { %p2518_p3 = por %p2517_p4, %p2516_p2 }
 0x6aa   : > { %p2519_p1 = pnand %p2518_p3, %p2512_p10 }
 0x6ac   : > { %2522 = shalt.err (!%p2519_p1)
}
 0x6ad   : > { %2200 = dma.vmem_to_hbm [thread:$0]  (%p3294_p7), %s3162_s17, 128, %s3160_s10, %s1851_s22  }
 0x6ae PF: > { %s3295_s6 = sld [smem:[#allocation21_spill]]  ;;  %s3296_s25 = sld [smem:[#allocation25_spill]] }
 0x6af   : > { %s3297_s13 = sld [smem:[#allocation24_spill]] }
 0x6b4   : > { %s1877_s30 = sand.u32 1, %s3295_s6   ;;  %p3298_p13 = scmp.ne.s32.totalorder %s3296_s25, 0 }
 0x6b5   : > { %p3299_p6 = scmp.ge.s32.totalorder %s3297_s13, 2  ;;  %s1878_s12 = scalar_lea.sflag [#allocation6], %s1877_s30 }
 0x6b7   : > { %p2223_p0 = pnand %p3299_p6, %p3298_p13 }
 0x6b9   : > { %2564 = dma.done.wait (!%p2223_p0), %s1878_s12, 128  }
 0x6ba   : > { %2566 = vsyncadd (!%p2223_p0), %s1878_s12, 4294967168  ;;  %s32_s22 = sadd.s32 1, %s3297_s13   ;;  %s3300_s23 = sld [smem:[#allocation28_spill]] }
 0x6bb   : > { %p29_p12 = scmp.ge.s32.totalorder %s32_s22, 4   ;;  %s3301_s20 = sld [smem:[#allocation23_spill]] }
 0x6bc   : > { %s3302_s21 = sld [smem:[#allocation26_spill]]  ;;  %s3303_s17 = smov %s2573_s18 }
 0x6bd   : > { %s3304_s18 = smov %s2577_s19  ;;  %31 = sbr.rel (!%p29_p12) target bundleno = 18 (0x12), region = 149 }
 0x6c0   : > { %s3305_s19 = smov %s3300_s23 }
 0x6c4   :  { %1883 = vsyncpa [#allocation5], 1 }
 0x6c5   :  { %1885 = vsyncpa [#allocation5 + $0x1], 1 }
 0x6c6   :  { %1886 = vsyncpa [#allocation8], 1 }
 0x6c7   :  { %1888 = vsyncpa [#allocation8 + $0x1], 1 }
 0x6c8   :  { %1889 = vsyncpa [#allocation11], 1 }
 0x6c9   :  { %1890 = vsyncpa [#allocation14], 1 }
 0x6ca   :  { %1891 = vsyncpa [#allocation6], 1 }
 0x6cb   :  { %1893 = vsyncpa [#allocation6 + $0x1], 1 }

</bundles_post_ra>
